<compile_context>
chip_gen: v7x
topology: tpu7x:2x2x1
jax: 0.10.0
libtpu: 0.0.40
codegen_flags: <defaults>
</compile_context>

<pallas_src>
import functools

import numpy as np

import jax
import jax.numpy as jnp
from jax import lax
from jax.experimental import pallas as pl
from jax.experimental.pallas import tpu as pltpu


# MXU operand dtype (bf16 per perf review; accumulation is always f32).
_MXU_DTYPE = jnp.bfloat16


def _ru(a, b):
    return ((a + b - 1) // b) * b


# ----------------------------- constant tables --------------------------------

def _tap_masks(Hg, Wg, Lp):
    """mask[t, p]: 1 iff flat position p=(r,c) is a real grid point of the
    Hg x Wg grid AND its 3x3 tap-t neighbour (r+dy-1, c+dx-1) is inside it."""
    m = np.zeros((9, Lp), np.float32)
    for dy in range(3):
        for dx in range(3):
            t = dy * 3 + dx
            for r in range(Hg):
                rr = r + dy - 1
                if rr < 0 or rr >= Hg:
                    continue
                cs = np.arange(Wg)
                cc = cs + dx - 1
                ok = (cc >= 0) & (cc < Wg)
                m[t, r * Wg + cs[ok]] = 1.0
    return m


def _subsample_selector(H, W, HWp, stride, Ho, Wo, Mp):
    """0/1 matrix S (HWp, Mp): column ho*Wo+wo picks flat input (s*ho, s*wo)."""
    S = np.zeros((HWp, Mp), np.float32)
    for ho in range(Ho):
        for wo in range(Wo):
            S[(stride * ho) * W + stride * wo, ho * Wo + wo] = 1.0
    return S


# ------------------------------- fused kernel --------------------------------

def _make_block_kernel(*, equal_in_out, stride, W, Wo, HWp, Mp, Mo, Cpi, Cpo):
    # out[p] needs in[p + off]; jnp.roll/pltpu.roll move data forward by
    # `shift`, so shift = (-off) mod length (kept non-negative & static).
    shifts1 = [(-((dy - 1) * W + (dx - 1))) % HWp
               for dy in range(3) for dx in range(3)]
    shifts2 = [(-((dy - 1) * Wo + (dx - 1))) % Mp
               for dy in range(3) for dx in range(3)]

    def kernel(*refs):
        (x_ref, s1_ref, b1_ref, w1_ref, m1_ref,
         s2_ref, b2_ref, w2_ref, m2_ref) = refs[:9]
        i = 9
        ws_ref = None
        ss_ref = None
        if not equal_in_out:
            ws_ref = refs[i]; i += 1
        if stride > 1:
            ss_ref = refs[i]; i += 1
        o_ref, st1_ref, st2_ref = refs[i], refs[i + 1], refs[i + 2]

        x = x_ref[0]                                        # (Cpi, HWp) f32

        # ---- bn1 + relu (channels on sublanes, spatial on lanes) ------------
        h1 = jnp.maximum(x * s1_ref[...] + b1_ref[...], 0.0)

        # ---- conv1 (3x3): roll + border mask -> im2col scratch -> 1 matmul --
        for t in range(9):
            r = h1 if shifts1[t] == 0 else pltpu.roll(h1, shifts1[t], axis=1)
            st1_ref[t * Cpi:(t + 1) * Cpi, :] = r * m1_ref[t:t + 1, :]
        c1_full = jnp.dot(w1_ref[...], st1_ref[...].astype(_MXU_DTYPE),
                          preferred_element_type=jnp.float32)    # (Cpo, HWp)

        # stride folded as an exact 0/1 strided-column pick (tiny matmul).
        if stride == 1:
            c1 = c1_full                                         # Mp == HWp
        else:
            c1 = jnp.dot(c1_full, ss_ref[...],
                         preferred_element_type=jnp.float32)     # (Cpo, Mp)

        # ---- bn2 + relu ------------------------------------------------------
        h2 = jnp.maximum(c1 * s2_ref[...] + b2_ref[...], 0.0)

        # ---- conv2 (3x3, stride 1) -------------------------------------------
        for t in range(9):
            r = h2 if shifts2[t] == 0 else pltpu.roll(h2, shifts2[t], axis=1)
            st2_ref[t * Cpo:(t + 1) * Cpo, :] = r * m2_ref[t:t + 1, :]
        c2 = jnp.dot(w2_ref[...], st2_ref[...].astype(_MXU_DTYPE),
                     preferred_element_type=jnp.float32)         # (Cpo, Mp)

        # ---- shortcut + fused residual add ------------------------------------
        if equal_in_out:
            sc = x                                               # identity, pre-BN x
        else:
            h1s = h1 if stride == 1 else jnp.dot(
                h1, ss_ref[...], preferred_element_type=jnp.float32)
            sc = jnp.dot(ws_ref[...], h1s,
                         preferred_element_type=jnp.float32)     # (Cpo, Mp)

        o_ref[0] = (sc + c2)[:, :Mo].astype(o_ref.dtype)

    return kernel


# ------------------------------ param preparation ----------------------------

def prepare_block(params, H, W, stride, equal_in_out, eps=1e-5):
    """Fold BN into scale/bias, pack conv weights for the im2col layout and
    precompute the tap border masks / strided-pick selector."""
    g1, be1, mu1, v1 = params["bn1"]
    g2, be2, mu2, v2 = params["bn2"]
    cin, cout = g1.shape[0], g2.shape[0]
    Cpi, Cpo = _ru(cin, 8), _ru(cout, 8)
    HW = H * W
    HWp = _ru(HW, 128)
    Ho = (H - 1) // stride + 1
    Wo = (W - 1) // stride + 1
    Mo = Ho * Wo
    Mp = _ru(Mo, 128)

    inv1 = g1 / jnp.sqrt(v1 + eps)
    inv2 = g2 / jnp.sqrt(v2 + eps)

    def pad_col(v, n):                      # (c,) -> (n, 1) f32, zero padded
        return jnp.zeros((n, 1), jnp.float32).at[:v.shape[0], 0].set(
            v.astype(jnp.float32))

    def pack_w(w, ci, co, cpi, cpo):
        # HWIO (3,3,ci,co) -> (cpo, 9*cpi), tap-major along K to match the
        # im2col scratch rows (t*cp .. t*cp+cp).
        wp = jnp.zeros((3, 3, cpi, cpo), jnp.float32).at[:, :, :ci, :co].set(
            w.astype(jnp.float32))
        return jnp.transpose(wp.reshape(9, cpi, cpo), (2, 0, 1)).reshape(
            cpo, 9 * cpi).astype(_MXU_DTYPE)

    prep = {
        "s1": pad_col(inv1, Cpi),
        "b1": pad_col(be1 - mu1 * inv1, Cpi),
        "s2": pad_col(inv2, Cpo),
        "b2": pad_col(be2 - mu2 * inv2, Cpo),
        "w1": pack_w(params["conv1_w"], cin, cout, Cpi, Cpo),
        "m1": jnp.asarray(_tap_masks(H, W, HWp)),
        "w2": pack_w(params["conv2_w"], cout, cout, Cpo, Cpo),
        "m2": jnp.asarray(_tap_masks(Ho, Wo, Mp)),
    }
    if not equal_in_out:
        wsp = jnp.zeros((Cpi, Cpo), jnp.float32).at[:cin, :cout].set(
            params["conv_sc_w"].astype(jnp.float32))
        prep["ws"] = jnp.transpose(wsp)                      # (Cpo, Cpi)
    if stride > 1:
        prep["ss"] = jnp.asarray(
            _subsample_selector(H, W, HWp, stride, Ho, Wo, Mp))
    return prep


# -------------------------------- forward pass --------------------------------

@functools.partial(jax.jit, static_argnames=("stride", "equal_in_out", "cout"))
def basic_block_forward(x_nchw, prep, *, stride, equal_in_out, cout):
    N, cin, H, W = x_nchw.shape
    HW = H * W
    HWp = _ru(HW, 128)
    Ho = (H - 1) // stride + 1
    Wo = (W - 1) // stride + 1
    Mo = Ho * Wo
    Mp = _ru(Mo, 128)
    Cpi, Cpo = _ru(cin, 8), _ru(cout, 8)
    if equal_in_out:
        assert stride == 1 and cin == cout    # WRN identity-shortcut invariant

    # NCHW -> (N, C, H*W): pure reshape (no relayout).  Only tiny conditional
    # zero pads up to the (8, 128) register tile.
    x = x_nchw.reshape(N, cin, HW).astype(jnp.float32)
    if HWp != HW or Cpi != cin:
        x = jnp.pad(x, ((0, 0), (0, Cpi - cin), (0, HWp - HW)))

    def const2d(shape):
        return pl.BlockSpec(shape, lambda n: (0, 0))

    in_specs = [
        pl.BlockSpec((1, Cpi, HWp), lambda n: (n, 0, 0)),   # x (one image / step)
        const2d((Cpi, 1)), const2d((Cpi, 1)),               # bn1 scale / bias
        const2d((Cpo, 9 * Cpi)),                            # conv1 weights (im2col)
        const2d((9, HWp)),                                   # conv1 border masks
        const2d((Cpo, 1)), const2d((Cpo, 1)),               # bn2 scale / bias
        const2d((Cpo, 9 * Cpo)),                            # conv2 weights (im2col)
        const2d((9, Mp)),                                    # conv2 border masks
    ]
    args = [x, prep["s1"], prep["b1"], prep["w1"], prep["m1"],
            prep["s2"], prep["b2"], prep["w2"], prep["m2"]]
    if not equal_in_out:
        in_specs.append(const2d((Cpo, Cpi)))                 # 1x1 shortcut weight^T
        args.append(prep["ws"])
    if stride > 1:
        in_specs.append(const2d((HWp, Mp)))                  # strided-column pick
        args.append(prep["ss"])

    kernel = _make_block_kernel(equal_in_out=equal_in_out, stride=stride, W=W,
                                Wo=Wo, HWp=HWp, Mp=Mp, Mo=Mo, Cpi=Cpi, Cpo=Cpo)

    out = pl.pallas_call(
        kernel,
        out_shape=jax.ShapeDtypeStruct((N, Cpo, Mo), jnp.float32),
        grid=(N,),
        in_specs=in_specs,
        out_specs=pl.BlockSpec((1, Cpo, Mo), lambda n: (n, 0, 0)),
        scratch_shapes=[pltpu.VMEM((9 * Cpi, HWp), jnp.float32),   # conv1 im2col stack
                        pltpu.VMEM((9 * Cpo, Mp), jnp.float32)],   # conv2 im2col stack
        compiler_params=pltpu.CompilerParams(
            dimension_semantics=("parallel",),
        ),
    )(*args)

    if Cpo != cout:
        out = out[:, :cout, :]
    return out.reshape(N, cout, Ho, Wo)                      # stays NCHW, free reshape


# ------------------------------- pure-JAX reference ---------------------------

def ref_forward(x_nchw, params, stride, equal_in_out, eps=1e-5):
    x = jnp.transpose(x_nchw, (0, 2, 3, 1)).astype(jnp.float32)
    dn = ("NHWC", "HWIO", "NHWC")

    def bnr(v, gamma, beta, mean, var):
        return jnp.maximum((v - mean) / jnp.sqrt(var + eps) * gamma + beta, 0.0)

    h1 = bnr(x, *params["bn1"])
    c1 = lax.conv_general_dilated(h1, params["conv1_w"], (stride, stride),
                                  ((1, 1), (1, 1)), dimension_numbers=dn,
                                  precision=lax.Precision.HIGHEST)
    h2 = bnr(c1, *params["bn2"])
    c2 = lax.conv_general_dilated(h2, params["conv2_w"], (1, 1),
                                  ((1, 1), (1, 1)), dimension_numbers=dn,
                                  precision=lax.Precision.HIGHEST)
    if equal_in_out:
        sc = x
    else:
        w_sc = params["conv_sc_w"].reshape(1, 1, *params["conv_sc_w"].shape)
        sc = lax.conv_general_dilated(h1, w_sc, (stride, stride),
                                      ((0, 0), (0, 0)), dimension_numbers=dn,
                                      precision=lax.Precision.HIGHEST)
    return jnp.transpose(sc + c2, (0, 3, 1, 2))


# ------------------------------------ main ------------------------------------

def make_params(key, cin, cout, equal_in_out):
    ks = jax.random.split(key, 11)
    params = {
        "bn1": (jax.random.normal(ks[0], (cin,)) * 0.1 + 1.0,     # gamma
                jax.random.normal(ks[1], (cin,)) * 0.1,           # beta
                jax.random.normal(ks[2], (cin,)) * 0.1,           # running_mean
                jax.random.uniform(ks[3], (cin,), minval=0.5, maxval=1.5)),
        "conv1_w": jax.random.normal(ks[4], (3, 3, cin, cout)) * 0.1,
        "bn2": (jax.random.normal(ks[5], (cout,)) * 0.1 + 1.0,
                jax.random.normal(ks[6], (cout,)) * 0.1,
                jax.random.normal(ks[7], (cout,)) * 0.1,
                jax.random.uniform(ks[8], (cout,), minval=0.5, maxval=1.5)),
        "conv2_w": jax.random.normal(ks[9], (3, 3, cout, cout)) * 0.1,
    }
    if not equal_in_out:
        params["conv_sc_w"] = jax.random.normal(ks[10], (cin, cout)) * 0.1
    return jax.tree_util.tree_map(lambda a: a.astype(jnp.float32), params)


if __name__ == "__main__":
    key = jax.random.PRNGKey(0)
    k1, k2, kx1, kx2 = jax.random.split(key, 4)
    # bf16 MXU operands vs. an f32 HIGHEST-precision XLA reference: observed
    # max-abs error is ~1e-2; structural bugs (wrong tap/roll/mask/stride/BN)
    # produce O(1) errors, so these bounds remain meaningful.
    MAX_TOL = 1e-1
    MEAN_TOL = 1.5e-2

    # --- Config 1: BasicBlock(in_planes=4, out_planes=8, stride=2) -----------
    cin, cout, stride = 4, 8, 2
    equal = cin == cout                         # False -> conv shortcut path
    N, H, W = 2, 16, 16
    params = make_params(k1, cin, cout, equal)
    prep = prepare_block(params, H, W, stride, equal)
    x = jax.random.normal(kx1, (N, cin, H, W), dtype=jnp.float32)   # NCHW

    out = jax.block_until_ready(
        basic_block_forward(x, prep, stride=stride, equal_in_out=equal, cout=cout))
    ref = jax.block_until_ready(ref_forward(x, params, stride, equal))
    Ho = (H - 1) // stride + 1
    Wo = (W - 1) // stride + 1
    assert out.shape == (N, cout, Ho, Wo), out.shape
    diff = jnp.abs(out - ref)
    assert float(diff.max()) < MAX_TOL and float(diff.mean()) < MEAN_TOL, \
        (float(diff.max()), float(diff.mean()))

    # --- Config 2: BasicBlock(in_planes=8, out_planes=8, stride=1) -----------
    cin2, cout2, stride2 = 8, 8, 1
    equal2 = cin2 == cout2                      # True -> identity shortcut path
    params2 = make_params(k2, cin2, cout2, equal2)
    prep2 = prepare_block(params2, H, W, stride2, equal2)
    x2 = jax.random.normal(kx2, (N, cin2, H, W), dtype=jnp.float32)

    out2 = jax.block_until_ready(
        basic_block_forward(x2, prep2, stride=stride2, equal_in_out=equal2,
                            cout=cout2))
    ref2 = jax.block_until_ready(ref_forward(x2, params2, stride2, equal2))
    assert out2.shape == (N, cout2, H, W), out2.shape
    diff2 = jnp.abs(out2 - ref2)
    assert float(diff2.max()) < MAX_TOL and float(diff2.mean()) < MEAN_TOL, \
        (float(diff2.max()), float(diff2.mean()))

    print("KERNEL_OK")
</pallas_src>

<mosaic_0001>
module attributes {stable_mosaic.version = 11 : i64} {
  func.func @kernel(%arg0: i32, %arg1: memref<1x8x256xf32, #tpu.memory_space<vmem>>, %arg2: memref<8x1xf32, #tpu.memory_space<vmem>>, %arg3: memref<8x1xf32, #tpu.memory_space<vmem>>, %arg4: memref<8x72xbf16, #tpu.memory_space<vmem>>, %arg5: memref<9x256xf32, #tpu.memory_space<vmem>>, %arg6: memref<8x1xf32, #tpu.memory_space<vmem>>, %arg7: memref<8x1xf32, #tpu.memory_space<vmem>>, %arg8: memref<8x72xbf16, #tpu.memory_space<vmem>>, %arg9: memref<9x128xf32, #tpu.memory_space<vmem>>, %arg10: memref<8x8xf32, #tpu.memory_space<vmem>>, %arg11: memref<256x128xf32, #tpu.memory_space<vmem>>, %arg12: memref<1x8x64xf32, #tpu.memory_space<vmem>>, %arg13: memref<72x256xf32, #tpu.memory_space<vmem>>, %arg14: memref<72x128xf32, #tpu.memory_space<vmem>>) attributes {dimension_semantics = [#tpu.dimension_semantics<parallel>], iteration_bounds = array<i64: 2>, scalar_prefetch = 0 : i64, scratch_operands = 2 : i64, tpu.core_type = #tpu.core_type<tc>, window_params = [{transform_indices = @transform_0, window_bounds = array<i64: 1, 8, 256>}, {pipeline_mode = #tpu.pipeline_mode<synchronous>, transform_indices = @transform_1, window_bounds = array<i64: 8, 1>}, {pipeline_mode = #tpu.pipeline_mode<synchronous>, transform_indices = @transform_2, window_bounds = array<i64: 8, 1>}, {pipeline_mode = #tpu.pipeline_mode<synchronous>, transform_indices = @transform_3, window_bounds = array<i64: 8, 72>}, {pipeline_mode = #tpu.pipeline_mode<synchronous>, transform_indices = @transform_4, window_bounds = array<i64: 9, 256>}, {pipeline_mode = #tpu.pipeline_mode<synchronous>, transform_indices = @transform_5, window_bounds = array<i64: 8, 1>}, {pipeline_mode = #tpu.pipeline_mode<synchronous>, transform_indices = @transform_6, window_bounds = array<i64: 8, 1>}, {pipeline_mode = #tpu.pipeline_mode<synchronous>, transform_indices = @transform_7, window_bounds = array<i64: 8, 72>}, {pipeline_mode = #tpu.pipeline_mode<synchronous>, transform_indices = @transform_8, window_bounds = array<i64: 9, 128>}, {pipeline_mode = #tpu.pipeline_mode<synchronous>, transform_indices = @transform_9, window_bounds = array<i64: 8, 8>}, {pipeline_mode = #tpu.pipeline_mode<synchronous>, transform_indices = @transform_10, window_bounds = array<i64: 256, 128>}, {transform_indices = @transform_11, window_bounds = array<i64: 1, 8, 64>}]} {
    %c0 = arith.constant 0 : index
    %c0_0 = arith.constant 0 : index
    %c0_1 = arith.constant 0 : index
    %0 = vector.load %arg1[%c0, %c0_0, %c0_1] : memref<1x8x256xf32, #tpu.memory_space<vmem>>, vector<1x8x256xf32>
    %1 = vector.shape_cast %0 : vector<1x8x256xf32> to vector<8x256xf32>
    %c0_2 = arith.constant 0 : index
    %c0_3 = arith.constant 0 : index
    %2 = vector.load %arg2[%c0_2, %c0_3] : memref<8x1xf32, #tpu.memory_space<vmem>>, vector<8x1xf32>
    %3 = vector.broadcast %2 : vector<8x1xf32> to vector<8x256xf32>
    %4 = arith.mulf %1, %3 : vector<8x256xf32>
    %c0_4 = arith.constant 0 : index
    %c0_5 = arith.constant 0 : index
    %5 = vector.load %arg3[%c0_4, %c0_5] : memref<8x1xf32, #tpu.memory_space<vmem>>, vector<8x1xf32>
    %6 = vector.broadcast %5 : vector<8x1xf32> to vector<8x256xf32>
    %7 = arith.addf %4, %6 : vector<8x256xf32>
    %cst = arith.constant 0.000000e+00 : f32
    %8 = vector.broadcast %cst : f32 to vector<8x256xf32>
    %9 = arith.maximumf %7, %8 : vector<8x256xf32>
    %c17_i32 = arith.constant 17 : i32
    %10 = tpu.dynamic_rotate %9 by %c17_i32 dim 1 : vector<8x256xf32>, i32 -> vector<8x256xf32>
    %c0_6 = arith.constant 0 : index
    %c0_7 = arith.constant 0 : index
    %11 = vector.load %arg5[%c0_6, %c0_7] : memref<9x256xf32, #tpu.memory_space<vmem>>, vector<1x256xf32>
    %12 = vector.broadcast %11 : vector<1x256xf32> to vector<8x256xf32>
    %13 = arith.mulf %10, %12 : vector<8x256xf32>
    %c0_8 = arith.constant 0 : index
    %c0_9 = arith.constant 0 : index
    %14 = vector.load %arg13[%c0_8, %c0_9] : memref<72x256xf32, #tpu.memory_space<vmem>>, vector<8x256xf32>
    tpu.vector_store %arg13[%c0_8, %c0_9], %13 {strides = array<i32>} : memref<72x256xf32, #tpu.memory_space<vmem>>, vector<8x256xf32>,
    %c16_i32 = arith.constant 16 : i32
    %15 = tpu.dynamic_rotate %9 by %c16_i32 dim 1 : vector<8x256xf32>, i32 -> vector<8x256xf32>
    %c1 = arith.constant 1 : index
    %c0_10 = arith.constant 0 : index
    %16 = vector.load %arg5[%c1, %c0_10] : memref<9x256xf32, #tpu.memory_space<vmem>>, vector<1x256xf32>
    %17 = vector.broadcast %16 : vector<1x256xf32> to vector<8x256xf32>
    %18 = arith.mulf %15, %17 : vector<8x256xf32>
    %c8 = arith.constant 8 : index
    %c0_11 = arith.constant 0 : index
    %19 = vector.load %arg13[%c8, %c0_11] : memref<72x256xf32, #tpu.memory_space<vmem>>, vector<8x256xf32>
    tpu.vector_store %arg13[%c8, %c0_11], %18 {strides = array<i32>} : memref<72x256xf32, #tpu.memory_space<vmem>>, vector<8x256xf32>,
    %c15_i32 = arith.constant 15 : i32
    %20 = tpu.dynamic_rotate %9 by %c15_i32 dim 1 : vector<8x256xf32>, i32 -> vector<8x256xf32>
    %c2 = arith.constant 2 : index
    %c0_12 = arith.constant 0 : index
    %21 = vector.load %arg5[%c2, %c0_12] : memref<9x256xf32, #tpu.memory_space<vmem>>, vector<1x256xf32>
    %22 = vector.broadcast %21 : vector<1x256xf32> to vector<8x256xf32>
    %23 = arith.mulf %20, %22 : vector<8x256xf32>
    %c16 = arith.constant 16 : index
    %c0_13 = arith.constant 0 : index
    %24 = vector.load %arg13[%c16, %c0_13] : memref<72x256xf32, #tpu.memory_space<vmem>>, vector<8x256xf32>
    tpu.vector_store %arg13[%c16, %c0_13], %23 {strides = array<i32>} : memref<72x256xf32, #tpu.memory_space<vmem>>, vector<8x256xf32>,
    %c1_i32 = arith.constant 1 : i32
    %25 = tpu.dynamic_rotate %9 by %c1_i32 dim 1 : vector<8x256xf32>, i32 -> vector<8x256xf32>
    %c3 = arith.constant 3 : index
    %c0_14 = arith.constant 0 : index
    %26 = vector.load %arg5[%c3, %c0_14] : memref<9x256xf32, #tpu.memory_space<vmem>>, vector<1x256xf32>
    %27 = vector.broadcast %26 : vector<1x256xf32> to vector<8x256xf32>
    %28 = arith.mulf %25, %27 : vector<8x256xf32>
    %c24 = arith.constant 24 : index
    %c0_15 = arith.constant 0 : index
    %29 = vector.load %arg13[%c24, %c0_15] : memref<72x256xf32, #tpu.memory_space<vmem>>, vector<8x256xf32>
    tpu.vector_store %arg13[%c24, %c0_15], %28 {strides = array<i32>} : memref<72x256xf32, #tpu.memory_space<vmem>>, vector<8x256xf32>,
    %c4 = arith.constant 4 : index
    %c0_16 = arith.constant 0 : index
    %30 = vector.load %arg5[%c4, %c0_16] : memref<9x256xf32, #tpu.memory_space<vmem>>, vector<1x256xf32>
    %31 = vector.broadcast %30 : vector<1x256xf32> to vector<8x256xf32>
    %32 = arith.mulf %9, %31 : vector<8x256xf32>
    %c32 = arith.constant 32 : index
    %c0_17 = arith.constant 0 : index
    %33 = vector.load %arg13[%c32, %c0_17] : memref<72x256xf32, #tpu.memory_space<vmem>>, vector<8x256xf32>
    tpu.vector_store %arg13[%c32, %c0_17], %32 {strides = array<i32>} : memref<72x256xf32, #tpu.memory_space<vmem>>, vector<8x256xf32>,
    %c255_i32 = arith.constant 255 : i32
    %34 = tpu.dynamic_rotate %9 by %c255_i32 dim 1 : vector<8x256xf32>, i32 -> vector<8x256xf32>
    %c5 = arith.constant 5 : index
    %c0_18 = arith.constant 0 : index
    %35 = vector.load %arg5[%c5, %c0_18] : memref<9x256xf32, #tpu.memory_space<vmem>>, vector<1x256xf32>
    %36 = vector.broadcast %35 : vector<1x256xf32> to vector<8x256xf32>
    %37 = arith.mulf %34, %36 : vector<8x256xf32>
    %c40 = arith.constant 40 : index
    %c0_19 = arith.constant 0 : index
    %38 = vector.load %arg13[%c40, %c0_19] : memref<72x256xf32, #tpu.memory_space<vmem>>, vector<8x256xf32>
    tpu.vector_store %arg13[%c40, %c0_19], %37 {strides = array<i32>} : memref<72x256xf32, #tpu.memory_space<vmem>>, vector<8x256xf32>,
    %c241_i32 = arith.constant 241 : i32
    %39 = tpu.dynamic_rotate %9 by %c241_i32 dim 1 : vector<8x256xf32>, i32 -> vector<8x256xf32>
    %c6 = arith.constant 6 : index
    %c0_20 = arith.constant 0 : index
    %40 = vector.load %arg5[%c6, %c0_20] : memref<9x256xf32, #tpu.memory_space<vmem>>, vector<1x256xf32>
    %41 = vector.broadcast %40 : vector<1x256xf32> to vector<8x256xf32>
    %42 = arith.mulf %39, %41 : vector<8x256xf32>
    %c48 = arith.constant 48 : index
    %c0_21 = arith.constant 0 : index
    %43 = vector.load %arg13[%c48, %c0_21] : memref<72x256xf32, #tpu.memory_space<vmem>>, vector<8x256xf32>
    tpu.vector_store %arg13[%c48, %c0_21], %42 {strides = array<i32>} : memref<72x256xf32, #tpu.memory_space<vmem>>, vector<8x256xf32>,
    %c240_i32 = arith.constant 240 : i32
    %44 = tpu.dynamic_rotate %9 by %c240_i32 dim 1 : vector<8x256xf32>, i32 -> vector<8x256xf32>
    %c7 = arith.constant 7 : index
    %c0_22 = arith.constant 0 : index
    %45 = vector.load %arg5[%c7, %c0_22] : memref<9x256xf32, #tpu.memory_space<vmem>>, vector<1x256xf32>
    %46 = vector.broadcast %45 : vector<1x256xf32> to vector<8x256xf32>
    %47 = arith.mulf %44, %46 : vector<8x256xf32>
    %c56 = arith.constant 56 : index
    %c0_23 = arith.constant 0 : index
    %48 = vector.load %arg13[%c56, %c0_23] : memref<72x256xf32, #tpu.memory_space<vmem>>, vector<8x256xf32>
    tpu.vector_store %arg13[%c56, %c0_23], %47 {strides = array<i32>} : memref<72x256xf32, #tpu.memory_space<vmem>>, vector<8x256xf32>,
    %c239_i32 = arith.constant 239 : i32
    %49 = tpu.dynamic_rotate %9 by %c239_i32 dim 1 : vector<8x256xf32>, i32 -> vector<8x256xf32>
    %c8_24 = arith.constant 8 : index
    %c0_25 = arith.constant 0 : index
    %50 = vector.load %arg5[%c8_24, %c0_25] : memref<9x256xf32, #tpu.memory_space<vmem>>, vector<1x256xf32>
    %51 = vector.broadcast %50 : vector<1x256xf32> to vector<8x256xf32>
    %52 = arith.mulf %49, %51 : vector<8x256xf32>
    %c64 = arith.constant 64 : index
    %c0_26 = arith.constant 0 : index
    %53 = vector.load %arg13[%c64, %c0_26] : memref<72x256xf32, #tpu.memory_space<vmem>>, vector<8x256xf32>
    tpu.vector_store %arg13[%c64, %c0_26], %52 {strides = array<i32>} : memref<72x256xf32, #tpu.memory_space<vmem>>, vector<8x256xf32>,
    %c0_27 = arith.constant 0 : index
    %c0_28 = arith.constant 0 : index
    %54 = vector.load %arg4[%c0_27, %c0_28] : memref<8x72xbf16, #tpu.memory_space<vmem>>, vector<8x72xbf16>
    %c0_29 = arith.constant 0 : index
    %c0_30 = arith.constant 0 : index
    %55 = vector.load %arg13[%c0_29, %c0_30] : memref<72x256xf32, #tpu.memory_space<vmem>>, vector<72x256xf32>
    %56 = arith.truncf %55 : vector<72x256xf32> to vector<72x256xbf16>
    %cst_31 = arith.constant dense<0.000000e+00> : vector<8x256xf32>
    %57 = tpu.matmul %54, %56, %cst_31 {dimension_numbers = #tpu.dot_dimension_numbers<[1], [0], [0], [1], [0, 0, 1, 1], [], []>} : vector<8x72xbf16>, vector<72x256xbf16>, vector<8x256xf32> -> vector<8x256xf32>
    %c0_32 = arith.constant 0 : index
    %c0_33 = arith.constant 0 : index
    %58 = vector.load %arg11[%c0_32, %c0_33] : memref<256x128xf32, #tpu.memory_space<vmem>>, vector<256x128xf32>
    %cst_34 = arith.constant dense<0.000000e+00> : vector<8x128xf32>
    %59 = tpu.matmul %57, %58, %cst_34 {dimension_numbers = #tpu.dot_dimension_numbers<[1], [0], [0], [1], [0, 0, 1, 1], [], []>} : vector<8x256xf32>, vector<256x128xf32>, vector<8x128xf32> -> vector<8x128xf32>
    %c0_35 = arith.constant 0 : index
    %c0_36 = arith.constant 0 : index
    %60 = vector.load %arg6[%c0_35, %c0_36] : memref<8x1xf32, #tpu.memory_space<vmem>>, vector<8x1xf32>
    %61 = vector.broadcast %60 : vector<8x1xf32> to vector<8x128xf32>
    %62 = arith.mulf %59, %61 : vector<8x128xf32>
    %c0_37 = arith.constant 0 : index
    %c0_38 = arith.constant 0 : index
    %63 = vector.load %arg7[%c0_37, %c0_38] : memref<8x1xf32, #tpu.memory_space<vmem>>, vector<8x1xf32>
    %64 = vector.broadcast %63 : vector<8x1xf32> to vector<8x128xf32>
    %65 = arith.addf %62, %64 : vector<8x128xf32>
    %cst_39 = arith.constant 0.000000e+00 : f32
    %66 = vector.broadcast %cst_39 : f32 to vector<8x128xf32>
    %67 = arith.maximumf %65, %66 : vector<8x128xf32>
    %c9_i32 = arith.constant 9 : i32
    %68 = tpu.dynamic_rotate %67 by %c9_i32 dim 1 : vector<8x128xf32>, i32 -> vector<8x128xf32>
    %c0_40 = arith.constant 0 : index
    %c0_41 = arith.constant 0 : index
    %69 = vector.load %arg9[%c0_40, %c0_41] : memref<9x128xf32, #tpu.memory_space<vmem>>, vector<1x128xf32>
    %70 = vector.broadcast %69 : vector<1x128xf32> to vector<8x128xf32>
    %71 = arith.mulf %68, %70 : vector<8x128xf32>
    %c0_42 = arith.constant 0 : index
    %c0_43 = arith.constant 0 : index
    %72 = vector.load %arg14[%c0_42, %c0_43] : memref<72x128xf32, #tpu.memory_space<vmem>>, vector<8x128xf32>
    tpu.vector_store %arg14[%c0_42, %c0_43], %71 {strides = array<i32>} : memref<72x128xf32, #tpu.memory_space<vmem>>, vector<8x128xf32>,
    %c8_i32 = arith.constant 8 : i32
    %73 = tpu.dynamic_rotate %67 by %c8_i32 dim 1 : vector<8x128xf32>, i32 -> vector<8x128xf32>
    %c1_44 = arith.constant 1 : index
    %c0_45 = arith.constant 0 : index
    %74 = vector.load %arg9[%c1_44, %c0_45] : memref<9x128xf32, #tpu.memory_space<vmem>>, vector<1x128xf32>
    %75 = vector.broadcast %74 : vector<1x128xf32> to vector<8x128xf32>
    %76 = arith.mulf %73, %75 : vector<8x128xf32>
    %c8_46 = arith.constant 8 : index
    %c0_47 = arith.constant 0 : index
    %77 = vector.load %arg14[%c8_46, %c0_47] : memref<72x128xf32, #tpu.memory_space<vmem>>, vector<8x128xf32>
    tpu.vector_store %arg14[%c8_46, %c0_47], %76 {strides = array<i32>} : memref<72x128xf32, #tpu.memory_space<vmem>>, vector<8x128xf32>,
    %c7_i32 = arith.constant 7 : i32
    %78 = tpu.dynamic_rotate %67 by %c7_i32 dim 1 : vector<8x128xf32>, i32 -> vector<8x128xf32>
    %c2_48 = arith.constant 2 : index
    %c0_49 = arith.constant 0 : index
    %79 = vector.load %arg9[%c2_48, %c0_49] : memref<9x128xf32, #tpu.memory_space<vmem>>, vector<1x128xf32>
    %80 = vector.broadcast %79 : vector<1x128xf32> to vector<8x128xf32>
    %81 = arith.mulf %78, %80 : vector<8x128xf32>
    %c16_50 = arith.constant 16 : index
    %c0_51 = arith.constant 0 : index
    %82 = vector.load %arg14[%c16_50, %c0_51] : memref<72x128xf32, #tpu.memory_space<vmem>>, vector<8x128xf32>
    tpu.vector_store %arg14[%c16_50, %c0_51], %81 {strides = array<i32>} : memref<72x128xf32, #tpu.memory_space<vmem>>, vector<8x128xf32>,
    %c1_i32_52 = arith.constant 1 : i32
    %83 = tpu.dynamic_rotate %67 by %c1_i32_52 dim 1 : vector<8x128xf32>, i32 -> vector<8x128xf32>
    %c3_53 = arith.constant 3 : index
    %c0_54 = arith.constant 0 : index
    %84 = vector.load %arg9[%c3_53, %c0_54] : memref<9x128xf32, #tpu.memory_space<vmem>>, vector<1x128xf32>
    %85 = vector.broadcast %84 : vector<1x128xf32> to vector<8x128xf32>
    %86 = arith.mulf %83, %85 : vector<8x128xf32>
    %c24_55 = arith.constant 24 : index
    %c0_56 = arith.constant 0 : index
    %87 = vector.load %arg14[%c24_55, %c0_56] : memref<72x128xf32, #tpu.memory_space<vmem>>, vector<8x128xf32>
    tpu.vector_store %arg14[%c24_55, %c0_56], %86 {strides = array<i32>} : memref<72x128xf32, #tpu.memory_space<vmem>>, vector<8x128xf32>,
    %c4_57 = arith.constant 4 : index
    %c0_58 = arith.constant 0 : index
    %88 = vector.load %arg9[%c4_57, %c0_58] : memref<9x128xf32, #tpu.memory_space<vmem>>, vector<1x128xf32>
    %89 = vector.broadcast %88 : vector<1x128xf32> to vector<8x128xf32>
    %90 = arith.mulf %67, %89 : vector<8x128xf32>
    %c32_59 = arith.constant 32 : index
    %c0_60 = arith.constant 0 : index
    %91 = vector.load %arg14[%c32_59, %c0_60] : memref<72x128xf32, #tpu.memory_space<vmem>>, vector<8x128xf32>
    tpu.vector_store %arg14[%c32_59, %c0_60], %90 {strides = array<i32>} : memref<72x128xf32, #tpu.memory_space<vmem>>, vector<8x128xf32>,
    %c127_i32 = arith.constant 127 : i32
    %92 = tpu.dynamic_rotate %67 by %c127_i32 dim 1 : vector<8x128xf32>, i32 -> vector<8x128xf32>
    %c5_61 = arith.constant 5 : index
    %c0_62 = arith.constant 0 : index
    %93 = vector.load %arg9[%c5_61, %c0_62] : memref<9x128xf32, #tpu.memory_space<vmem>>, vector<1x128xf32>
    %94 = vector.broadcast %93 : vector<1x128xf32> to vector<8x128xf32>
    %95 = arith.mulf %92, %94 : vector<8x128xf32>
    %c40_63 = arith.constant 40 : index
    %c0_64 = arith.constant 0 : index
    %96 = vector.load %arg14[%c40_63, %c0_64] : memref<72x128xf32, #tpu.memory_space<vmem>>, vector<8x128xf32>
    tpu.vector_store %arg14[%c40_63, %c0_64], %95 {strides = array<i32>} : memref<72x128xf32, #tpu.memory_space<vmem>>, vector<8x128xf32>,
    %c121_i32 = arith.constant 121 : i32
    %97 = tpu.dynamic_rotate %67 by %c121_i32 dim 1 : vector<8x128xf32>, i32 -> vector<8x128xf32>
    %c6_65 = arith.constant 6 : index
    %c0_66 = arith.constant 0 : index
    %98 = vector.load %arg9[%c6_65, %c0_66] : memref<9x128xf32, #tpu.memory_space<vmem>>, vector<1x128xf32>
    %99 = vector.broadcast %98 : vector<1x128xf32> to vector<8x128xf32>
    %100 = arith.mulf %97, %99 : vector<8x128xf32>
    %c48_67 = arith.constant 48 : index
    %c0_68 = arith.constant 0 : index
    %101 = vector.load %arg14[%c48_67, %c0_68] : memref<72x128xf32, #tpu.memory_space<vmem>>, vector<8x128xf32>
    tpu.vector_store %arg14[%c48_67, %c0_68], %100 {strides = array<i32>} : memref<72x128xf32, #tpu.memory_space<vmem>>, vector<8x128xf32>,
    %c120_i32 = arith.constant 120 : i32
    %102 = tpu.dynamic_rotate %67 by %c120_i32 dim 1 : vector<8x128xf32>, i32 -> vector<8x128xf32>
    %c7_69 = arith.constant 7 : index
    %c0_70 = arith.constant 0 : index
    %103 = vector.load %arg9[%c7_69, %c0_70] : memref<9x128xf32, #tpu.memory_space<vmem>>, vector<1x128xf32>
    %104 = vector.broadcast %103 : vector<1x128xf32> to vector<8x128xf32>
    %105 = arith.mulf %102, %104 : vector<8x128xf32>
    %c56_71 = arith.constant 56 : index
    %c0_72 = arith.constant 0 : index
    %106 = vector.load %arg14[%c56_71, %c0_72] : memref<72x128xf32, #tpu.memory_space<vmem>>, vector<8x128xf32>
    tpu.vector_store %arg14[%c56_71, %c0_72], %105 {strides = array<i32>} : memref<72x128xf32, #tpu.memory_space<vmem>>, vector<8x128xf32>,
    %c119_i32 = arith.constant 119 : i32
    %107 = tpu.dynamic_rotate %67 by %c119_i32 dim 1 : vector<8x128xf32>, i32 -> vector<8x128xf32>
    %c8_73 = arith.constant 8 : index
    %c0_74 = arith.constant 0 : index
    %108 = vector.load %arg9[%c8_73, %c0_74] : memref<9x128xf32, #tpu.memory_space<vmem>>, vector<1x128xf32>
    %109 = vector.broadcast %108 : vector<1x128xf32> to vector<8x128xf32>
    %110 = arith.mulf %107, %109 : vector<8x128xf32>
    %c64_75 = arith.constant 64 : index
    %c0_76 = arith.constant 0 : index
    %111 = vector.load %arg14[%c64_75, %c0_76] : memref<72x128xf32, #tpu.memory_space<vmem>>, vector<8x128xf32>
    tpu.vector_store %arg14[%c64_75, %c0_76], %110 {strides = array<i32>} : memref<72x128xf32, #tpu.memory_space<vmem>>, vector<8x128xf32>,
    %c0_77 = arith.constant 0 : index
    %c0_78 = arith.constant 0 : index
    %112 = vector.load %arg8[%c0_77, %c0_78] : memref<8x72xbf16, #tpu.memory_space<vmem>>, vector<8x72xbf16>
    %c0_79 = arith.constant 0 : index
    %c0_80 = arith.constant 0 : index
    %113 = vector.load %arg14[%c0_79, %c0_80] : memref<72x128xf32, #tpu.memory_space<vmem>>, vector<72x128xf32>
    %114 = arith.truncf %113 : vector<72x128xf32> to vector<72x128xbf16>
    %cst_81 = arith.constant dense<0.000000e+00> : vector<8x128xf32>
    %115 = tpu.matmul %112, %114, %cst_81 {dimension_numbers = #tpu.dot_dimension_numbers<[1], [0], [0], [1], [0, 0, 1, 1], [], []>} : vector<8x72xbf16>, vector<72x128xbf16>, vector<8x128xf32> -> vector<8x128xf32>
    %c0_82 = arith.constant 0 : index
    %c0_83 = arith.constant 0 : index
    %116 = vector.load %arg11[%c0_82, %c0_83] : memref<256x128xf32, #tpu.memory_space<vmem>>, vector<256x128xf32>
    %cst_84 = arith.constant dense<0.000000e+00> : vector<8x128xf32>
    %117 = tpu.matmul %9, %116, %cst_84 {dimension_numbers = #tpu.dot_dimension_numbers<[1], [0], [0], [1], [0, 0, 1, 1], [], []>} : vector<8x256xf32>, vector<256x128xf32>, vector<8x128xf32> -> vector<8x128xf32>
    %c0_85 = arith.constant 0 : index
    %c0_86 = arith.constant 0 : index
    %118 = vector.load %arg10[%c0_85, %c0_86] : memref<8x8xf32, #tpu.memory_space<vmem>>, vector<8x8xf32>
    %cst_87 = arith.constant dense<0.000000e+00> : vector<8x128xf32>
    %119 = tpu.matmul %118, %117, %cst_87 {dimension_numbers = #tpu.dot_dimension_numbers<[1], [0], [0], [1], [0, 0, 1, 1], [], []>} : vector<8x8xf32>, vector<8x128xf32>, vector<8x128xf32> -> vector<8x128xf32>
    %120 = arith.addf %119, %115 : vector<8x128xf32>
    %121 = vector.extract_strided_slice %120 {offsets = [0, 0], sizes = [8, 64], strides = [1, 1]} : vector<8x128xf32> to vector<8x64xf32>
    %c0_88 = arith.constant 0 : index
    %c0_89 = arith.constant 0 : index
    %c0_90 = arith.constant 0 : index
    %122 = vector.load %arg12[%c0_88, %c0_89, %c0_90] : memref<1x8x64xf32, #tpu.memory_space<vmem>>, vector<1x8x64xf32>
    %123 = vector.shape_cast %122 : vector<1x8x64xf32> to vector<8x64xf32>
    %124 = vector.shape_cast %121 : vector<8x64xf32> to vector<1x8x64xf32>
    tpu.vector_store %arg12[%c0_88, %c0_89, %c0_90], %124 {strides = array<i32>} : memref<1x8x64xf32, #tpu.memory_space<vmem>>, vector<1x8x64xf32>,
    return
  }
  func.func @transform_0(%arg0: i32) -> (i32, i32, i32) {
    %c0_i32 = arith.constant 0 : i32
    %c0_i32_0 = arith.constant 0 : i32
    %c0_i32_1 = arith.constant 0 : i32
    return %arg0, %c0_i32, %c0_i32_0 : i32, i32, i32
  }
  func.func @transform_1(%arg0: i32) -> (i32, i32) {
    %c0_i32 = arith.constant 0 : i32
    %c0_i32_0 = arith.constant 0 : i32
    %c0_i32_1 = arith.constant 0 : i32
    return %c0_i32, %c0_i32_0 : i32, i32
  }
  func.func @transform_2(%arg0: i32) -> (i32, i32) {
    %c0_i32 = arith.constant 0 : i32
    %c0_i32_0 = arith.constant 0 : i32
    %c0_i32_1 = arith.constant 0 : i32
    return %c0_i32, %c0_i32_0 : i32, i32
  }
  func.func @transform_3(%arg0: i32) -> (i32, i32) {
    %c0_i32 = arith.constant 0 : i32
    %c0_i32_0 = arith.constant 0 : i32
    %c0_i32_1 = arith.constant 0 : i32
    return %c0_i32, %c0_i32_0 : i32, i32
  }
  func.func @transform_4(%arg0: i32) -> (i32, i32) {
    %c0_i32 = arith.constant 0 : i32
    %c0_i32_0 = arith.constant 0 : i32
    %c0_i32_1 = arith.constant 0 : i32
    return %c0_i32, %c0_i32_0 : i32, i32
  }
  func.func @transform_5(%arg0: i32) -> (i32, i32) {
    %c0_i32 = arith.constant 0 : i32
    %c0_i32_0 = arith.constant 0 : i32
    %c0_i32_1 = arith.constant 0 : i32
    return %c0_i32, %c0_i32_0 : i32, i32
  }
  func.func @transform_6(%arg0: i32) -> (i32, i32) {
    %c0_i32 = arith.constant 0 : i32
    %c0_i32_0 = arith.constant 0 : i32
    %c0_i32_1 = arith.constant 0 : i32
    return %c0_i32, %c0_i32_0 : i32, i32
  }
  func.func @transform_7(%arg0: i32) -> (i32, i32) {
    %c0_i32 = arith.constant 0 : i32
    %c0_i32_0 = arith.constant 0 : i32
    %c0_i32_1 = arith.constant 0 : i32
    return %c0_i32, %c0_i32_0 : i32, i32
  }
  func.func @transform_8(%arg0: i32) -> (i32, i32) {
    %c0_i32 = arith.constant 0 : i32
    %c0_i32_0 = arith.constant 0 : i32
    %c0_i32_1 = arith.constant 0 : i32
    return %c0_i32, %c0_i32_0 : i32, i32
  }
  func.func @transform_9(%arg0: i32) -> (i32, i32) {
    %c0_i32 = arith.constant 0 : i32
    %c0_i32_0 = arith.constant 0 : i32
    %c0_i32_1 = arith.constant 0 : i32
    return %c0_i32, %c0_i32_0 : i32, i32
  }
  func.func @transform_10(%arg0: i32) -> (i32, i32) {
    %c0_i32 = arith.constant 0 : i32
    %c0_i32_0 = arith.constant 0 : i32
    %c0_i32_1 = arith.constant 0 : i32
    return %c0_i32, %c0_i32_0 : i32, i32
  }
  func.func @transform_11(%arg0: i32) -> (i32, i32, i32) {
    %c0_i32 = arith.constant 0 : i32
    %c0_i32_0 = arith.constant 0 : i32
    %c0_i32_1 = arith.constant 0 : i32
    return %arg0, %c0_i32, %c0_i32_0 : i32, i32, i32
  }
}

</mosaic_0001>

<bundles_post_ra>
// kernel: basic_block_forward.1
= control target key start
LH: loop header
LB: loop body
LE: loop exit
PB: predicated region body
PF: predicated region fallthrough
CT: control target
= control target key end

     0   :  { %16 = vsyncpa [#allocation5], 0  ;;  %s1568_s17 = smov 0   ;;  %s1844_s0 = inlined_call_operand.vmem [shape: f32[2,8,256], index: 0, kind: input, shape index: {}]   ;;  %s1845_s1 = inlined_call_operand.vmem [shape: f32[8,1], index: 1, kind: input, shape index: {}]   ;;  %s1846_s2 = inlined_call_operand.vmem [shape: f32[8,1], index: 2, kind: input, shape index: {}]   ;;  %s1847_s3 = inlined_call_operand.vmem [shape: bf16[8,72], index: 3, kind: input, shape index: {}]   ;;  %s1848_s4 = inlined_call_operand.vmem [shape: f32[9,256], index: 4, kind: input, shape index: {}]   ;;  %s1849_s5 = inlined_call_operand.vmem [shape: f32[8,1], index: 5, kind: input, shape index: {}]   ;;  %s1850_s6 = inlined_call_operand.vmem [shape: f32[8,1], index: 6, kind: input, shape index: {}]   ;;  %s1851_s7 = inlined_call_operand.vmem [shape: bf16[8,72], index: 7, kind: input, shape index: {}]   ;;  %s1852_s8 = inlined_call_operand.vmem [shape: f32[9,128], index: 8, kind: input, shape index: {}]   ;;  %s1853_s9 = inlined_call_operand.vmem [shape: f32[8,8], index: 9, kind: input, shape index: {}]   ;;  %s1854_s10 = inlined_call_operand.hbm [shape: f32[256,128], index: 10, kind: input, shape index: {}]   ;;  %s1855_s11 = inlined_call_operand.vmem [shape: f32[2,8,64], index: 11, kind: output, shape index: {}]  }
   0x1 LB: > { %s1574_s18 = sadd.s32 4294967295, %s1486_s17   ;;  %p1215_p0 = scmp.ge.s32.totalorder %s1486_s17, 1  ;;  %s1486_s17 = sphi %s1568_s17, %s22_s17  }
   0x2   : > { %p289_p1 = scmp.lt.s32.totalorder %s1486_s17, 3  ;;  %s1488_s19 = smov [#allocation4]  }
   0x3   : > { %s328_s20 = sshll.u32 %s1488_s19, 4  ;;  %p1856_p3 = scmp.eq.s32.totalorder %s1574_s18, 0  ;;  %s329_s20 = int_to_ptr.vmem [resolvable:$true] %s328_s20 }
   0x4   : > { %p1578_p2 = pnand %p1215_p0, %p289_p1  ;;  %s1448_s25 = scalar_lea.hbm %s1854_s10, 4096 }
   0x5   : > { %p1449_p6 = scmp.ne.s32.totalorder %s1854_s10, %s1448_s25  ;;  %p1455_p10 = scmp.lt.u32.totalorder %s1448_s25, %s1854_s10 }
   0x6   : > { %s1858_s21 = scalar_select %p1578_p2, 1, 0 }
   0x7   : > { %p1412_p4 = pneg %p1578_p2 }
   0x9   : > { %p1587_p5 = pnand %p1856_p3, %p1412_p4 }
   0xb   : > { %p1450_p7 = pneg %p1587_p5 }
   0xd   : > { %p1451_p8 = pnand %p1450_p7, %p1449_p6 }
   0xf   : > { %p1452_p9 = pneg %p1451_p8 }
  0x11   : > { %p1457_p11 = pnand %p1455_p10, %p1452_p9 }
  0x13   : > { %1460 = shalt.err (!%p1457_p11)
}
  0x14   : > { %s1461_s30 = scalar_lea.vmem %s329_s20, 4096  ;;  %p1469_p1 = scmp.lt.s32.totalorder %s329_s20, %s329_s20 }
  0x15   : > { %p1462_p12 = scmp.ne.s32.totalorder %s329_s20, %s1461_s30  ;;  %p1470_p4 = scmp.lt.s32.totalorder %s1461_s30, %s1461_s30 }
  0x17   : > { %p1464_p13 = pnand %p1462_p12, %p1450_p7  ;;  %p1471_p3 = por %p1470_p4, %p1469_p1 }
  0x19   : > { %p1465_p0 = pneg %p1464_p13 }
  0x1b   : > { %p1472_p2 = pnand %p1471_p3, %p1465_p0 }
  0x1d   : > { %1475 = shalt.err (!%p1472_p2)
}
  0x1e   : > { %s1489_s12 = smov 128   ;;  %s1490_s13 = smov 8  }
  0x1f   : > { %1415 = dma.hbm_to_vmem [thread:$0]  (!%p1587_p5), %s1854_s10, 4096, %s329_s20, [#allocation5], %s1489_s12, %s1489_s12, %s1490_s13  }
  0x20   : > { %p1860_p6 = scmp.ne.s32.totalorder %s1858_s21, 0 }
  0x21   : > { %p1861_p8 = scmp.eq.s32.totalorder (!%p1860_p6), %s1574_s18, 0 }
  0x22   : > { %352 = sbr.rel (%p1860_p6) target bundleno = 1132 (0x46c), region = 64 }
  0x29   : > { %1481 = dma.done.wait (%p1861_p8), [#allocation5], 4096   ;;  %p1862_p7 = pmov %p1861_p8 }
  0x2a   : > { %v1491_v0 = vmov 0   ;;  %v403_v1 = vld [vmem:[%s1845_s1] sm:$0xff]  ;;  %p391_p2 = scmp.lt.s32.totalorder %s1574_s18, 1  ;;  %s1492_s26 = smov 16   ;;  %v729_v15 = vld [vmem:[#allocation4 + $0x88] sm:$0xff]  ;;  %v730_v19 = vld [vmem:[#allocation4 + $0x90] sm:$0xff]  ;;  %v425_v62 = vlaneseq }
  0x2b   : > { %1483 = vsyncadd (%p1862_p7), [#allocation5], 4294963200  ;;  %1446 = vset.pattern.permute.xlu0 %v1491_v0  ;;  %703 = vmatprep.mubr.bf16.mxu0 %v1491_v0  ;;  %v411_v2 = vld [vmem:[%s1846_s2] sm:$0xff]  ;;  %s1493_s27 = smov 17   ;;  %s1494_s28 = smov 15   ;;  %v713_v18 = vld [vmem:[#allocation4 + $0x8] sm:$0xff] }
  0x2c   : > { %1447 = vset.pattern.permute.xlu1 %v1491_v0  ;;  %406 = vperm.xlu0 %1446, %v403_v1   ;;  %s1864_s18 = smov (!%p391_p2, %s1574_s18), 1  ;;  %s1495_s29 = smov 1   ;;  %v814_v13 = vld [vmem:[%s1849_s5] sm:$0xff]  ;;  %v731_v20 = vld [vmem:[#allocation4 + $0x98] sm:$0xff]  ;;  %v714_v23 = vld [vmem:[#allocation4 + $0x10] sm:$0xff]  ;;  %v433_v63 = vshrl.u32 %v425_v62, 7 }
  0x2d   : > { %s1246_s22 = sshll.u32 %s1864_s18, 4  ;;  %s1496_s30 = smov 127   ;;  %v728_v14 = vld [vmem:[#allocation4 + $0x80] sm:$0xff]  ;;  %v1655_v22 = vpack.c.bf16 %v731_v20, %v730_v19  ;;  %v715_v24 = vld [vmem:[#allocation4 + $0x18] sm:$0xff]  ;;  %v733_v26 = vld [vmem:[#allocation4 + $0xa8] sm:$0xff]  ;;  %vm664_vm8 = vcmask 1043456  }
  0x2e   : > { %s395_s25 = scalar_lea.vmem %s1844_s0, %s1246_s22  ;;  %s1497_s12 = smov 113   ;;  %v712_v16 = vld [vmem:[#allocation4] sm:$0xff]  ;;  %v1344_v17 = vpack.c.bf16 %v729_v15, %v728_v14  ;;  %v1659_v27 = vpack.c.bf16 %v715_v24, %v714_v23  ;;  %v717_v30 = vld [vmem:[#allocation4 + $0x28] sm:$0xff]  ;;  %v734_v31 = vld [vmem:[#allocation4 + $0xb0] sm:$0xff]  ;;  %vm660_vm9 = vcmask 588800   ;;  %vm1505_vm10 = vmmov 0  }
  0x2f   : > { %v401_v4 = vld [vmem:[%s395_s25] sm:$0xff]  ;;  %v402_v5 = vld [vmem:[%s395_s25 + $0x8] sm:$0xff]  ;;  %s1498_s13 = smov 112   ;;  %s1499_s14 = smov 111   ;;  %v1653_v21 = vpack.c.bf16 %v713_v18, %v712_v16  ;;  %v735_v32 = vld [vmem:[#allocation4 + $0xb8] sm:$0xff]  ;;  %vm1072_vm11 = vcmask 64512  }
  0x30   : > { %414 = vperm.xlu0 %1446, %v411_v2   ;;  %v732_v25 = vld [vmem:[#allocation4 + $0xa0] sm:$0xff]  ;;  %1345 = vmatprep.subr.bf16.mxu1 %v1344_v17  ;;  %v1668_v34 = vpack.c.bf16 %v735_v32, %v734_v31  ;;  %v718_v35 = vld [vmem:[#allocation4 + $0x30] sm:$0xff]  ;;  %v719_v36 = vld [vmem:[#allocation4 + $0x38] sm:$0xff]  ;;  %v1699_v2 = vand.u32 127, %v425_v62  ;;  %s1222_s20 = sshll.u32 %s1864_s18, 3  ;;  %vm1146_vm12 = vcmask 523264  }
  0x31   : > { %1347 = vmatpush3.bf16.msra.mxu1 %v1653_v21  ;;  %v1662_v28 = vpack.c.bf16 %v733_v26, %v732_v25  ;;  %v716_v29 = vld [vmem:[#allocation4 + $0x20] sm:$0xff]  ;;  %v737_v38 = vld [vmem:[#allocation4 + $0xc8] sm:$0xff]  ;;  %v1671_v39 = vpack.c.bf16 %v719_v36, %v718_v35  ;;  %v738_v43 = vld [vmem:[#allocation4 + $0xd0] sm:$0xff]  ;;  %s399_s23 = scalar_lea.vmem %s1855_s11, %s1222_s20 }
  0x32   : > { %1349 = vmatprep.subr.bf16.mxu1 %v1655_v22  ;;  %v1665_v33 = vpack.c.bf16 %v717_v30, %v716_v29  ;;  %v736_v37 = vld [vmem:[#allocation4 + $0xc0] sm:$0xff]  ;;  %v721_v42 = vld [vmem:[#allocation4 + $0x48] sm:$0xff]  ;;  %v739_v44 = vld [vmem:[#allocation4 + $0xd8] sm:$0xff]  ;;  %vm427_vm0 = vcmp.lt.s32.totalorder %v1699_v2, 17  ;;  %vm450_vm1 = vcmp.lt.s32.totalorder %v1699_v2, 16  ;;  %vm474_vm2 = vcmp.lt.s32.totalorder %v1699_v2, 15 }
  0x33   : > { %v1674_v40 = vpack.c.bf16 %v737_v38, %v736_v37  ;;  %v720_v41 = vld [vmem:[#allocation4 + $0x40] sm:$0xff]  ;;  %v1680_v46 = vpack.c.bf16 %v739_v44, %v738_v43  ;;  %v722_v47 = vld [vmem:[#allocation4 + $0x50] sm:$0xff]  ;;  %v723_v48 = vld [vmem:[#allocation4 + $0x58] sm:$0xff]  ;;  %vm498_vm3 = vcmp.lt.s32.totalorder %v1699_v2, 1  ;;  %vm539_vm4 = vcmp.lt.s32.totalorder %v1699_v2, 127 }
  0x34   : > { %v1677_v45 = vpack.c.bf16 %v721_v42, %v720_v41  ;;  %v740_v49 = vld [vmem:[#allocation4 + $0xe0] sm:$0xff]  ;;  %v741_v50 = vld [vmem:[#allocation4 + $0xe8] sm:$0xff]  ;;  %v1683_v51 = vpack.c.bf16 %v723_v48, %v722_v47  ;;  %v742_v55 = vld [vmem:[#allocation4 + $0xf0] sm:$0xff]  ;;  %vm563_vm5 = vcmp.lt.s32.totalorder %v1699_v2, 113  ;;  %vm587_vm6 = vcmp.lt.s32.totalorder %v1699_v2, 112 }
  0x35   : > { %1351 = vmatpush3.bf16.msra.mxu1 %v1659_v27  ;;  %v1686_v52 = vpack.c.bf16 %v741_v50, %v740_v49  ;;  %v724_v53 = vld [vmem:[#allocation4 + $0x60] sm:$0xff]  ;;  %v725_v54 = vld [vmem:[#allocation4 + $0x68] sm:$0xff]  ;;  %v743_v56 = vld [vmem:[#allocation4 + $0xf8] sm:$0xff]  ;;  %vm611_vm7 = vcmp.lt.s32.totalorder %v1699_v2, 111 }
  0x36   : > { %1353 = vmatprep.subr.bf16.mxu1 %v1662_v28  ;;  %v1689_v57 = vpack.c.bf16 %v725_v54, %v724_v53  ;;  %v1692_v58 = vpack.c.bf16 %v743_v56, %v742_v55  ;;  %v726_v59 = vld [vmem:[#allocation4 + $0x70] sm:$0xff]  ;;  %v727_v60 = vld [vmem:[#allocation4 + $0x78] sm:$0xff]  ;;  %v1224_v25 = vld [vmem:[%s1848_s4 + $0x2] ss:$8 sm:$0x3] }
  0x37   : > { %v1695_v61 = vpack.c.bf16 %v727_v60, %v726_v59  ;;  %v1225_v30 = vld [vmem:[%s1848_s4 + $0x3] ss:$8 sm:$0x3]  ;;  %v1226_v37 = vld [vmem:[%s1848_s4 + $0x4] ss:$8 sm:$0x3] }
  0x38   : > { %v1227_v44 = vld [vmem:[%s1848_s4 + $0x5] ss:$8 sm:$0x3] }
  0x39   : > { %1355 = vmatpush3.bf16.msra.mxu1 %v1665_v33 }
  0x3a   : > { %1357 = vmatprep.subr.bf16.mxu1 %v1668_v34 }
  0x3d   : > { %1359 = vmatpush3.bf16.msra.mxu1 %v1671_v39 }
  0x3e   : > { %1361 = vmatprep.subr.bf16.mxu1 %v1674_v40 }
  0x41   : > { %1363 = vmatpush3.bf16.msra.mxu1 %v1677_v45 }
  0x42   : > { %1365 = vmatprep.subr.bf16.mxu1 %v1680_v46 }
  0x45   : > { %1367 = vmatpush3.bf16.msra.mxu1 %v1683_v51 }
  0x46   : > { %1369 = vmatprep.subr.bf16.mxu1 %v1686_v52 }
  0x49   : > { %1371 = vmatpush3.bf16.msra.mxu1 %v1689_v57 }
  0x4a   : > { %1373 = vmatprep.subr.bf16.mxu1 %v1692_v58 }
  0x4d   : > { %1375 = vmatpush3.bf16.msra.mxu1 %v1695_v61 }
  0x4e   : > { %1377 = vmatprep.subr.bf16.mxu1 %v1344_v17 }
  0xab   : > { %v407_v3 = vpop.permute.xlu0 %406 }
  0xac   : > { %v409_v6 = vmul.f32 %v407_v3, %v401_v4  ;;  %v410_v8 = vmul.f32 %v407_v3, %v402_v5  ;;  %v430_v3 = vld [vmem:[%s1848_s4] ss:$8 sm:$0x3]  ;;  %v1704_v4 = vsub.s32 0, %v433_v63 }
  0xad   : > { %v1223_v5 = vld [vmem:[%s1848_s4 + $0x1] ss:$8 sm:$0x3] }
  0xae   : > { %v483_v36 = vrot.slane %v1224_v25, %v1704_v4  ;;  %v507_v42 = vrot.slane %v1225_v30, %v1704_v4  ;;  %v524_v53 = vrot.slane %v1226_v37, %v1704_v4  ;;  %v548_v56 = vrot.slane %v1227_v44, %v1704_v4 }
  0xaf   : > { %v415_v7 = vpop.permute.xlu0 %414 }
  0xb0   : > { %v417_v9 = vadd.f32 %v415_v7, %v409_v6  ;;  %v418_v10 = vadd.f32 %v415_v7, %v410_v8  ;;  %v1710_v7 = vsub.s32 1, %v433_v63 }
  0xb2   : > { %v1627_v11 = vmax.f32 %v417_v9, 0.0  ;;  %v1631_v12 = vmax.f32 %v418_v10, 0.0  ;;  %v435_v9 = vrot.slane %v430_v3, %v1704_v4  ;;  %v459_v10 = vrot.slane %v1223_v5, %v1704_v4 }
  0xb3   : > { %v463_v14 = vrot.slane %v1223_v5, %v1710_v7  ;;  %v487_v41 = vrot.slane %v1224_v25, %v1710_v7  ;;  %v511_v43 = vrot.slane %v1225_v30, %v1710_v7  ;;  %v528_v50 = vrot.slane %v1226_v37, %v1710_v7  ;;  %v1230_v30 = vld [vmem:[%s1848_s4 + $0x10] ss:$8 sm:$0x3] }
  0xb4   : > { %446 = vrot.lane.b32.xlu0 %v1627_v11, %s1492_s26  ;;  %421 = vrot.lane.b32.xlu1 %v1627_v11, %s1493_s27  ;;  %v552_v59 = vrot.slane %v1227_v44, %v1710_v7 }
  0xb8   : > { %470 = vrot.lane.b32.xlu0 %v1627_v11, %s1494_s28  ;;  %423 = vrot.lane.b32.xlu1 %v1631_v12, %s1493_s27  ;;  %s1502_s27 = smov 9  }
  0xbc   : > { %494 = vrot.lane.b32.xlu0 %v1627_v11, %s1495_s29  ;;  %448 = vrot.lane.b32.xlu1 %v1631_v12, %s1492_s26  ;;  %s1501_s26 = smov 8  }
  0xc0   : > { %535 = vrot.lane.b32.xlu0 %v1627_v11, %s1496_s30  ;;  %472 = vrot.lane.b32.xlu1 %v1631_v12, %s1494_s28  ;;  %s1503_s28 = smov 7  }
  0xc4   : > { %559 = vrot.lane.b32.xlu0 %v1627_v11, %s1497_s12  ;;  %496 = vrot.lane.b32.xlu1 %v1631_v12, %s1495_s29 }
  0xc8   : > { %583 = vrot.lane.b32.xlu0 %v1627_v11, %s1498_s13  ;;  %537 = vrot.lane.b32.xlu1 %v1631_v12, %s1496_s30 }
  0xcc   : > { %607 = vrot.lane.b32.xlu0 %v1627_v11, %s1499_s14  ;;  %561 = vrot.lane.b32.xlu1 %v1631_v12, %s1497_s12  ;;  %s1504_s12 = smov 121  }
  0xd0   : > { %817 = vperm.xlu0 %1446, %v814_v13   ;;  %585 = vrot.lane.b32.xlu1 %v1631_v12, %s1498_s13  ;;  %v439_v13 = vrot.slane %v430_v3, %v1710_v7  ;;  %s1506_s13 = smov 119  }
  0xd4   : > { %609 = vrot.lane.b32.xlu1 %v1631_v12, %s1499_s14  ;;  %s1507_s14 = smov 120  }
 0x126   : > { %v447_v0 = vpop.permute.xlu0 %446  ;;  %v422_v1 = vpop.permute.xlu1 %421 }
 0x12a   : > { %v471_v6 = vpop.permute.xlu0 %470  ;;  %v424_v8 = vpop.permute.xlu1 %423 }
 0x12b   : > { %v428_v15 = vsel %vm427_vm0, %v422_v1, %v424_v8  ;;  %v429_v16 = vsel %vm427_vm0, %v424_v8, %v422_v1 }
 0x12c   : > { %v442_v23 = vmul.f32 %v435_v9, %v429_v16  ;;  %v443_v26 = vmul.f32 %v439_v13, %v428_v15  ;;  %v532_v15 = vmul.f32 %v528_v50, %v1631_v12  ;;  %v531_v16 = vmul.f32 %v524_v53, %v1627_v11 }
 0x12e   : > { %v495_v17 = vpop.permute.xlu0 %494  ;;  %v449_v18 = vpop.permute.xlu1 %448 }
 0x12f   : > { %v451_v19 = vsel %vm450_vm1, %v447_v0, %v449_v18  ;;  %v452_v20 = vsel %vm450_vm1, %v449_v18, %v447_v0 }
 0x130   : > { %v466_v24 = vmul.f32 %v459_v10, %v452_v20  ;;  %v467_v29 = vmul.f32 %v463_v14, %v451_v19  ;;  %v1228_v14 = vld [vmem:[%s1848_s4 + $0x6] ss:$8 sm:$0x3] }
 0x131   : > { %v576_v25 = vrot.slane %v1228_v14, %v1710_v7 }
 0x132   : > { %v473_v31 = vpop.permute.xlu1 %472  ;;  %v651_v32 = vpack.c.bf16 %v467_v29, %v443_v26  ;;  %v650_v35 = vpack.c.bf16 %v466_v24, %v442_v23  ;;  %v536_v38 = vpop.permute.xlu0 %535  ;;  %v572_v23 = vrot.slane %v1228_v14, %v1704_v4 }
 0x133   : > { %v475_v47 = vsel %vm474_vm2, %v471_v6, %v473_v31  ;;  %v476_v48 = vsel %vm474_vm2, %v473_v31, %v471_v6 }
 0x134   : > { %671 = vmatprep.subr.bf16.mxu0 %v651_v32  ;;  %v490_v60 = vmul.f32 %v483_v36, %v476_v48  ;;  %v491_v62 = vmul.f32 %v487_v41, %v475_v47  ;;  %v624_v41 = vrot.slane %v1230_v30, %v1710_v7 }
 0x135   : > { %672 = vmatpush1.bf16.msra.mxu0 %v650_v35 }
 0x136   : > { %v497_v49 = vpop.permute.xlu1 %496  ;;  %v560_v1 = vpop.permute.xlu0 %559 }
 0x137   : > { %v499_v54 = vsel %vm498_vm3, %v495_v17, %v497_v49  ;;  %v500_v55 = vsel %vm498_vm3, %v497_v49, %v495_v17  ;;  %v1229_v17 = vld [vmem:[%s1848_s4 + $0x7] ss:$8 sm:$0x3] }
 0x138   : > { %v514_v63 = vmul.f32 %v507_v42, %v500_v55  ;;  %v515_v0 = vmul.f32 %v511_v43, %v499_v54  ;;  %v596_v26 = vrot.slane %v1229_v17, %v1704_v4  ;;  %v600_v29 = vrot.slane %v1229_v17, %v1710_v7  ;;  %v631_v7 = vld [vmem:[%s1847_s3] sm:$0xf]  ;;  %v1238_v17 = vld [vmem:[%s1852_s8 + $0x5] ss:$0 sm:$0xff] }
 0x13a   : > { %v538_v3 = vpop.permute.xlu1 %537  ;;  %v653_v5 = vpack.c.bf16 %v515_v0, %v491_v62  ;;  %v652_v6 = vpack.c.bf16 %v514_v63, %v490_v60  ;;  %v584_v24 = vpop.permute.xlu0 %583  ;;  %v821_v62 = vld [vmem:[%s1850_s6] sm:$0xff] }
 0x13b   : > { %v540_v8 = vsel %vm539_vm4, %v536_v38, %v538_v3  ;;  %v541_v9 = vsel %vm539_vm4, %v538_v3, %v536_v38  ;;  %v620_v38 = vrot.slane %v1230_v30, %v1704_v4  ;;  %824 = vperm.xlu1 %1447, %v821_v62  }
 0x13c   : > { %v555_v10 = vmul.f32 %v548_v56, %v540_v8  ;;  %v556_v13 = vmul.f32 %v552_v59, %v541_v9  ;;  %673 = vmatprep.subr.bf16.mxu0 %v653_v5  ;;  %v1235_v8 = vld [vmem:[%s1852_s8 + $0x2] ss:$0 sm:$0xff] }
 0x13d   : > { %674 = vmatpush1.bf16.msra.mxu0 %v652_v6  ;;  %v1236_v6 = vld [vmem:[%s1852_s8 + $0x3] ss:$0 sm:$0xff] }
 0x13e   : > { %v562_v18 = vpop.permute.xlu1 %561  ;;  %v655_v19 = vpack.c.bf16 %v556_v13, %v532_v15  ;;  %v654_v20 = vpack.c.bf16 %v555_v10, %v531_v16  ;;  %v608_v48 = vpop.permute.xlu0 %607  ;;  %v1237_v16 = vld [vmem:[%s1852_s8 + $0x4] ss:$0 sm:$0xff] }
 0x13f   : > { %v564_v31 = vsel %vm563_vm5, %v560_v1, %v562_v18  ;;  %v565_v32 = vsel %vm563_vm5, %v562_v18, %v560_v1 }
 0x140   : > { %675 = vmatprep.subr.bf16.mxu0 %v655_v19  ;;  %v579_v42 = vmul.f32 %v572_v23, %v564_v31  ;;  %v580_v43 = vmul.f32 %v576_v25, %v565_v32  ;;  %v1239_v25 = vld [vmem:[%s1852_s8 + $0x6] ss:$0 sm:$0xff] }
 0x141   : > { %676 = vmatpush1.bf16.msra.mxu0 %v654_v20 }
 0x142   : > { %v586_v35 = vpop.permute.xlu1 %585 }
 0x143   : > { %v588_v36 = vsel %vm587_vm6, %v584_v24, %v586_v35  ;;  %v589_v37 = vsel %vm587_vm6, %v586_v35, %v584_v24 }
 0x144   : > { %v603_v44 = vmul.f32 %v596_v26, %v588_v36  ;;  %v604_v47 = vmul.f32 %v600_v29, %v589_v37  ;;  %v1241_v26 = vld [vmem:[%s1852_s8 + $0x8] ss:$0 sm:$0xff]  ;;  %v1240_v29 = vld [vmem:[%s1852_s8 + $0x7] ss:$0 sm:$0xff] }
 0x146   : > { %v610_v49 = vpop.permute.xlu1 %609  ;;  %v657_v50 = vpack.c.bf16 %v604_v47, %v580_v43  ;;  %v656_v53 = vpack.c.bf16 %v603_v44, %v579_v42  ;;  %v908_v43 = vld [vmem:[%s1851_s7] sm:$0xf] }
 0x147   : > { %v612_v54 = vsel %vm611_vm7, %v608_v48, %v610_v49  ;;  %v613_v55 = vsel %vm611_vm7, %v610_v49, %v608_v48  ;;  %v1071_v44 = vld [vmem:[%s1853_s9] sm:$0xff] }
 0x148   : > { %v627_v56 = vmul.f32 %v620_v38, %v612_v54  ;;  %v628_v59 = vmul.f32 %v624_v41, %v613_v55  ;;  %677 = vmatprep.subr.bf16.mxu0 %v657_v50 }
 0x149   : > { %678 = vmatpush1.bf16.msra.mxu0 %v656_v53 }
 0x14a   : > { %v658_v2 = vpack.c.bf16 %v627_v56, %v627_v56  ;;  %v659_v60 = vpack.c.bf16 %v628_v59, %v628_v59 }
 0x14c   : > { %1231 = vmatprep.subr.msk.bf16.mxu0 %vm664_vm8, %v659_v60  ;;  %v666_v4 = vsel %vm664_vm8, %v658_v2, 0 }
 0x14d   : > { %680 = vmatpush1.bf16.msra.mxu0 %v666_v4 }
 0x150   : > { %1232 = vmatmul.mubr.msk.bf16.vlgmr.msra.gmra.mrb[0].mxu0 %vm660_vm9, %v631_v7 }
 0x223   : > { %v705_v63 = vpop.f32.mrb[0].mxu0 }
 0x224   : > { %v707_v0 = vpop.f32.mrb[1].mxu0 }
 0x225   : > { %v709_v1 = vpop.f32.mrb[2].mxu0  ;;  %808 = vmatprep.mubr.f32.mxu1 %v707_v0 }
 0x226   : > { %v710_v3 = vpop.f32.mrb[3].mxu0  ;;  %809 = vmatmul.mubr.f32.vlgmr.msra.gmra.mrb[0].mxu1 %v705_v63 }
 0x227   : > { %1379 = vmatpush3.bf16.msra.mxu1 %v1653_v21  ;;  %1065 = vmatprep.mubr.f32.mxu1 %v1631_v12  ;;  %v1500_v21 = vmov 0.0  }
 0x228   : > { %1381 = vmatprep.subr.bf16.mxu1 %v1655_v22  ;;  %1325 = vmatprep.subr.bf16.mxu0 %v1500_v21 }
 0x229   : > { %1335 = vmatprep.mubr.msk.bf16.mxu0 %vm1505_vm10, %v1500_v21 }
 0x22b   : > { %1383 = vmatpush3.bf16.msra.mxu1 %v1659_v27 }
 0x22c   : > { %1385 = vmatprep.subr.bf16.mxu1 %v1662_v28  ;;  %v818_v28 = vpop.permute.xlu0 %817 }
 0x22f   : > { %1387 = vmatpush3.bf16.msra.mxu1 %v1665_v33  ;;  %v825_v33 = vpop.permute.xlu1 %824 }
 0x230   : > { %1389 = vmatprep.subr.bf16.mxu1 %v1668_v34 }
 0x233   : > { %1391 = vmatpush3.bf16.msra.mxu1 %v1671_v39 }
 0x234   : > { %1393 = vmatprep.subr.bf16.mxu1 %v1674_v40 }
 0x237   : > { %1395 = vmatpush3.bf16.msra.mxu1 %v1677_v45 }
 0x238   : > { %1397 = vmatprep.subr.bf16.mxu1 %v1680_v46 }
 0x23b   : > { %1399 = vmatpush3.bf16.msra.mxu1 %v1683_v51  ;;  %v1234_v51 = vld [vmem:[%s1852_s8 + $0x1] ss:$0 sm:$0xff] }
 0x23c   : > { %1401 = vmatprep.subr.bf16.mxu1 %v1686_v52  ;;  %v1233_v52 = vld [vmem:[%s1852_s8] ss:$0 sm:$0xff] }
 0x23f   : > { %1403 = vmatpush3.bf16.msra.mxu1 %v1689_v57 }
 0x240   : > { %1405 = vmatprep.subr.bf16.mxu1 %v1692_v58 }
 0x243   : > { %1407 = vmatpush3.bf16.msra.mxu1 %v1695_v61 }
 0x246   : > { %1066 = vmatmul.mubr.f32.vlgmr.msra.gmra.mrb[2].mxu1 %v1627_v11 }
 0x2f9   : > { %v1279_v12 = vpop.f32.mrb[0].mxu1 }
 0x2fa   : > { %v1280_v22 = vpop.f32.mrb[1].mxu1 }
 0x2fb   : > { %v1281_v27 = vadd.f32 %v1280_v22, %v1279_v12 }
 0x2fd   : > { %v820_v34 = vmul.f32 %v1281_v27, %v818_v28 }
 0x2ff   : > { %v827_v39 = vadd.f32 %v825_v33, %v820_v34 }
 0x301   : > { %v828_v40 = vmax.f32 %v827_v39, 0.0 }
 0x303   : > { %838 = vrot.lane.b32.xlu1 %v828_v40, %s1501_s26  ;;  %829 = vrot.lane.b32.xlu0 %v828_v40, %s1502_s27  ;;  %v870_v23 = vmul.f32 %v1237_v16, %v828_v40 }
 0x307   : > { %856 = vrot.lane.b32.xlu1 %v828_v40, %s1495_s29  ;;  %847 = vrot.lane.b32.xlu0 %v828_v40, %s1503_s28 }
 0x30b   : > { %881 = vrot.lane.b32.xlu1 %v828_v40, %s1504_s12  ;;  %872 = vrot.lane.b32.xlu0 %v828_v40, %s1496_s30 }
 0x30f   : > { %899 = vrot.lane.b32.xlu1 %v828_v40, %s1506_s13  ;;  %890 = vrot.lane.b32.xlu0 %v828_v40, %s1507_s14 }
 0x319   : > { %v1320_v11 = vpop.f32.mrb[2].mxu1 }
 0x31a   : > { %v1321_v45 = vpop.f32.mrb[3].mxu1 }
 0x31b   : > { %v1322_v46 = vadd.f32 %v1321_v45, %v1320_v11 }
 0x375   : > { %v839_v57 = vpop.permute.xlu1 %838  ;;  %v830_v58 = vpop.permute.xlu0 %829 }
 0x376   : > { %v845_v61 = vmul.f32 %v1234_v51, %v839_v57  ;;  %v836_v5 = vmul.f32 %v1233_v52, %v830_v58 }
 0x378   : > { %v918_v9 = vpack.c.bf16 %v845_v61, %v836_v5 }
 0x379   : > { %v857_v10 = vpop.permute.xlu1 %856  ;;  %v848_v13 = vpop.permute.xlu0 %847 }
 0x37a   : > { %v863_v14 = vmul.f32 %v1236_v6, %v857_v10  ;;  %v854_v15 = vmul.f32 %v1235_v8, %v848_v13  ;;  %1326 = vmatpush3.bf16.msra.mxu0 %v918_v9 }
 0x37b   : > { %1327 = vmatprep.subr.bf16.mxu0 %v1500_v21 }
 0x37c   : > { %v919_v18 = vpack.c.bf16 %v863_v14, %v854_v15 }
 0x37d   : > { %v882_v19 = vpop.permute.xlu1 %881  ;;  %v873_v20 = vpop.permute.xlu0 %872 }
 0x37e   : > { %v879_v24 = vmul.f32 %v1238_v17, %v873_v20  ;;  %1328 = vmatpush3.bf16.msra.mxu0 %v919_v18  ;;  %v888_v35 = vmul.f32 %v1239_v25, %v882_v19 }
 0x37f   : > { %1329 = vmatprep.subr.bf16.mxu0 %v1500_v21 }
 0x380   : > { %v920_v30 = vpack.c.bf16 %v879_v24, %v870_v23 }
 0x381   : > { %v900_v31 = vpop.permute.xlu1 %899  ;;  %v891_v32 = vpop.permute.xlu0 %890 }
 0x382   : > { %v906_v36 = vmul.f32 %v1241_v26, %v900_v31  ;;  %v897_v37 = vmul.f32 %v1240_v29, %v891_v32  ;;  %1330 = vmatpush3.bf16.msra.mxu0 %v920_v30 }
 0x383   : > { %1331 = vmatprep.subr.bf16.mxu0 %v1500_v21 }
 0x384   : > { %v921_v38 = vpack.c.bf16 %v897_v37, %v888_v35  ;;  %v922_v41 = vpack.c.bf16 %v906_v36, %v906_v36 }
 0x386   : > { %1332 = vmatpush3.bf16.msra.mxu0 %v921_v38  ;;  %v927_v42 = vsel %vm664_vm8, %v922_v41, 0 }
 0x387   : > { %1333 = vmatprep.subr.bf16.mxu0 %v1500_v21 }
 0x38a   : > { %1334 = vmatpush3.bf16.msra.mxu0 %v927_v42 }
 0x38b   : > { %1339 = vmatprep.subr.mxu0 %v1500_v21 }
 0x38d   : > { %1336 = vmatmul.mubr.msk.bf16.vlgmr.msra.gmra.mrb[4].mxu0 %vm660_vm9, %v908_v43 }
 0x38e   : > { %1340 = vmatpush3.msra.mxu0 %v1322_v46  ;;  %1341 = vmatprep.mubr.msk.f32.mxu0 %vm1505_vm10, %v1500_v21 }
 0x395   : > { %1342 = vmatmul.mubr.msk.f32.vlgmr.msra.gmra.mrb[8].mxu0 %vm1072_vm11, %v1071_v44 }
 0x460   : > { %v963_v47 = vpop.f32.mrb[4].mxu0 }
 0x461   : > { %v1337_v48 = vpop.f32.mrb[5].mxu0 }
 0x462   : > { %v966_v49 = vpop.f32.mrb[6].mxu0 }
 0x463   : > { %v1338_v50 = vpop.f32.mrb[7].mxu0 }
 0x468   : > { %v1142_v53 = vpop.f32.mrb[8].mxu0 }
 0x469   : > { %v1143_v54 = vadd.f32 %v1142_v53, %v963_v47  ;;  %v1343_v55 = vpop.f32.mrb[9].mxu0 }
 0x46b   : > { %1147 = vst.msk [vmem:[%s399_s23] sm:$0xff] %vm1146_vm12, %v1143_v54 }
 0x46c PF: > { %s22_s17 = sadd.s32 1, %s1486_s17  }
 0x46d   : > { %p19_p3 = scmp.ge.s32.totalorder %s22_s17, 4  }
 0x46f   :  { %21 = sbr.rel (!%p19_p3) target bundleno = 1 (0x1), region = 107 }
 0x476   :  { %1167 = vsyncpa [#allocation5], 1 }
 0x477   :  { %1169 = vsyncpa [#allocation5 + $0x1], 1 }

</bundles_post_ra>
